<compile_context>
chip_gen: v7x
topology: tpu7x:2x2x1
jax: 0.10.0
libtpu: 0.0.40
codegen_flags: <defaults>
</compile_context>

<pallas_src>
import jax
import jax.numpy as jnp
from jax import lax
from jax.experimental import pallas as pl
from jax.experimental.pallas import tpu as pltpu

LANE = 128        # feature dims padded to lane width
ROW_TILE = 128    # dst-node rows per grid step
EDGE_TILE = 128   # edges per reduction grid step


# ----------------------------------------------------------------------------
# helpers (wrapper-side preprocessing, runs in XLA)
# ----------------------------------------------------------------------------
def _round_up(x, m):
    return ((x + m - 1) // m) * m


def _pad2(a, rows, cols):
    a = jnp.asarray(a, jnp.float32)
    return jnp.pad(a, ((0, rows - a.shape[0]), (0, cols - a.shape[1])))


def _vmem_limit_bytes():
    # ~75% of physical VMEM: ~48 MiB on v7x (64 MiB), ~96 MiB on v5e/v6e (128 MiB).
    try:
        cap = int(pltpu.get_tpu_info().vmem_capacity_bytes)
        return (cap * 3) // 4
    except Exception:
        return 48 * 1024 * 1024


# ----------------------------------------------------------------------------
# kernel bodies
# ----------------------------------------------------------------------------
def _aggregate(src_ref, lo_ref, hi_ref, dst_ref, hfull_ref, g_scr, acc_scr):
    """acc[r,:] += sum over edges e in this edge tile with dst==i*RT+r of h[src[e],:]."""
    i = pl.program_id(0)          # node row tile (parallel)
    e = pl.program_id(1)          # edge tile (reduction)

    @pl.when(e == 0)
    def _init():
        acc_scr[...] = jnp.zeros_like(acc_scr)

    lo = lo_ref[i]
    hi = hi_ref[i]

    # Block skip: only edge tiles that contain an edge whose dst falls in this
    # row tile do any work (edges are sorted by dst in the wrapper).
    @pl.when(jnp.logical_and(e >= lo, e < hi))
    def _accumulate():
        base = e * EDGE_TILE

        # Gather: pure data movement from the VMEM-resident h — no MXU work.
        def gather_row(j, carry):
            s = src_ref[base + j]
            g_scr[pl.ds(j, 1), :] = hfull_ref[pl.ds(s, 1), :]
            return carry

        lax.fori_loop(0, EDGE_TILE, gather_row, 0)

        # Scatter one-hot built in-kernel from the dst ids of this edge tile.
        # Padded / out-of-tile edges (dst outside [i*RT, (i+1)*RT), dst=-1) give
        # all-zero columns, so they contribute nothing.
        rows = lax.broadcasted_iota(jnp.int32, (ROW_TILE, EDGE_TILE), 0) + i * ROW_TILE
        p = (rows == dst_ref[...]).astype(jnp.float32)            # (RT, ET)
        acc_scr[...] += jnp.dot(p, g_scr[...], preferred_element_type=jnp.float32)


def _finalize_mlp(htile_ref, eps_ref, acc_scr, w1_ref, b1_ref, w2_ref, b2_ref):
    u = (1.0 + eps_ref[0, 0]) * htile_ref[...] + acc_scr[...]
    hid = jnp.maximum(
        jnp.dot(u, w1_ref[...], preferred_element_type=jnp.float32) + b1_ref[...],
        0.0)
    return jnp.dot(hid, w2_ref[...], preferred_element_type=jnp.float32) + b2_ref[...]


def _gin_layer_kernel(src_ref, lo_ref, hi_ref,
                      dst_ref, hfull_ref, htile_ref, eps_ref,
                      w1_ref, b1_ref, w2_ref, b2_ref,
                      out_ref, g_scr, acc_scr):
    _aggregate(src_ref, lo_ref, hi_ref, dst_ref, hfull_ref, g_scr, acc_scr)

    @pl.when(pl.program_id(1) == pl.num_programs(1) - 1)
    def _finalize():
        out_ref[...] = _finalize_mlp(htile_ref, eps_ref, acc_scr,
                                     w1_ref, b1_ref, w2_ref, b2_ref)


def _gin_layer_fcout_kernel(src_ref, lo_ref, hi_ref,
                            dst_ref, hfull_ref, htile_ref, eps_ref,
                            w1_ref, b1_ref, w2_ref, b2_ref,
                            wout_ref, bout_ref,
                            out_ref, g_scr, acc_scr):
    _aggregate(src_ref, lo_ref, hi_ref, dst_ref, hfull_ref, g_scr, acc_scr)

    @pl.when(pl.program_id(1) == pl.num_programs(1) - 1)
    def _finalize():
        h2 = _finalize_mlp(htile_ref, eps_ref, acc_scr,
                           w1_ref, b1_ref, w2_ref, b2_ref)
        out_ref[...] = (jnp.dot(h2, wout_ref[...], preferred_element_type=jnp.float32)
                        + bout_ref[...])


# ----------------------------------------------------------------------------
# pallas_call wrapper (one call per GIN layer; fc_out fused into the last one)
# ----------------------------------------------------------------------------
def _gin_layer(src_ids, blk_lo, blk_hi, dst_ids, h, eps, w1, b1, w2, b2, fcout=None):
    N_pad, Din = h.shape
    Hh = w1.shape[1]
    E_pad = src_ids.shape[0]
    R = N_pad // ROW_TILE
    Eb = E_pad // EDGE_TILE
    out_dim = Hh if fcout is None else fcout[0].shape[1]

    def dst_imap(i, e, src, lo, hi):
        # Clamp skipped edge tiles onto the active range so they are not re-DMA'd.
        last = jnp.maximum(lo[i], hi[i] - 1)
        return (0, jnp.clip(e, lo[i], last))

    def const_imap(i, e, src, lo, hi):
        return (0, 0)

    def row_imap(i, e, src, lo, hi):
        return (i, 0)

    in_specs = [
        pl.BlockSpec((1, EDGE_TILE), dst_imap),           # dst ids (sorted, pad = -1)
        pl.BlockSpec((N_pad, Din), const_imap),           # h, fully resident (gather source)
        pl.BlockSpec((ROW_TILE, Din), row_imap),          # h row tile for (1+eps)*h
        pl.BlockSpec((1, 1), const_imap, memory_space=pltpu.MemorySpace.SMEM),  # eps
        pl.BlockSpec((Din, Hh), const_imap),              # w1
        pl.BlockSpec((1, Hh), const_imap),                # b1
        pl.BlockSpec((Hh, Hh), const_imap),               # w2
        pl.BlockSpec((1, Hh), const_imap),                # b2
    ]
    args = [src_ids, blk_lo, blk_hi, dst_ids, h, h, eps, w1, b1, w2, b2]
    kernel = _gin_layer_kernel
    if fcout is not None:
        wout, bout = fcout
        in_specs += [pl.BlockSpec((Hh, out_dim), const_imap),
                     pl.BlockSpec((1, out_dim), const_imap)]
        args += [wout, bout]
        kernel = _gin_layer_fcout_kernel

    flops = (2 * E_pad * ROW_TILE * Din
             + 2 * N_pad * (Din * Hh + Hh * Hh)
             + (2 * N_pad * Hh * out_dim if fcout is not None else 0))
    bytes_accessed = (4 * (2 * N_pad * Din + N_pad * out_dim
                           + Din * Hh + 2 * Hh * Hh + Hh * out_dim)
                      + 4 * 2 * E_pad)

    return pl.pallas_call(
        kernel,
        out_shape=jax.ShapeDtypeStruct((N_pad, out_dim), jnp.float32),
        grid_spec=pltpu.PrefetchScalarGridSpec(
            num_scalar_prefetch=3,                       # src ids, blk_lo, blk_hi
            grid=(R, Eb),
            in_specs=in_specs,
            out_specs=pl.BlockSpec((ROW_TILE, out_dim), row_imap),
            scratch_shapes=[
                pltpu.VMEM((EDGE_TILE, Din), jnp.float32),   # gathered src rows
                pltpu.VMEM((ROW_TILE, Din), jnp.float32),    # aggregation accumulator
            ],
        ),
        compiler_params=pltpu.CompilerParams(
            dimension_semantics=("parallel", "arbitrary"),
            vmem_limit_bytes=_vmem_limit_bytes(),
        ),
        cost_estimate=pl.CostEstimate(flops=int(flops), transcendentals=0,
                                      bytes_accessed=int(bytes_accessed)),
    )(*args)


# ----------------------------------------------------------------------------
# forward
# ----------------------------------------------------------------------------
def gin_node_feature_update(node_features, edge_index, params):
    N, D = node_features.shape
    E = edge_index.shape[1]
    H = params["w1"].shape[1]

    Dp = _round_up(D, LANE)
    Hp = _round_up(H, LANE)
    N_pad = _round_up(max(N, 1), ROW_TILE)
    E_pad = _round_up(max(E, 1), EDGE_TILE)
    R = N_pad // ROW_TILE

    x = _pad2(node_features, N_pad, Dp)

    # Hoisted graph preprocessing (reusable across calls for a static graph):
    # sort edges by destination so each node row tile owns a contiguous edge range.
    src = jnp.asarray(edge_index[0], jnp.int32)
    dst = jnp.asarray(edge_index[1], jnp.int32)
    order = jnp.argsort(dst)
    src_s = src[order]
    dst_s = dst[order]

    src_ids = jnp.zeros((E_pad,), jnp.int32).at[:E].set(src_s)           # SMEM (prefetch)
    dst_ids = jnp.full((1, E_pad), -1, jnp.int32).at[0, :E].set(dst_s)   # VMEM, lane-major

    row_starts = jnp.arange(R, dtype=jnp.int32) * ROW_TILE
    first = jnp.searchsorted(dst_s, row_starts, side="left").astype(jnp.int32)
    last = jnp.searchsorted(dst_s, row_starts + ROW_TILE, side="left").astype(jnp.int32)
    has_edges = last > first
    blk_lo = jnp.where(has_edges, first // EDGE_TILE, 0).astype(jnp.int32)
    blk_hi = jnp.where(has_edges, (last - 1) // EDGE_TILE + 1, 0).astype(jnp.int32)

    w1 = _pad2(params["w1"], Dp, Hp); b1 = _pad2(params["b1"], 1, Hp)
    w2 = _pad2(params["w2"], Hp, Hp); b2 = _pad2(params["b2"], 1, Hp)
    w3 = _pad2(params["w3"], Hp, Hp); b3 = _pad2(params["b3"], 1, Hp)
    w4 = _pad2(params["w4"], Hp, Hp); b4 = _pad2(params["b4"], 1, Hp)
    wout = _pad2(params["wout"], Hp, Dp); bout = _pad2(params["bout"], 1, Dp)
    eps0 = jnp.asarray(params["eps0"], jnp.float32).reshape(1, 1)
    eps1 = jnp.asarray(params["eps1"], jnp.float32).reshape(1, 1)

    # TODO(synk): for very large N, move the gather source h to pl.ANY (HBM) with an
    # in-kernel double-buffered DMA row gather instead of keeping it VMEM-resident.
    h1 = _gin_layer(src_ids, blk_lo, blk_hi, dst_ids, x, eps0, w1, b1, w2, b2)
    out = _gin_layer(src_ids, blk_lo, blk_hi, dst_ids, h1, eps1, w3, b3, w4, b4,
                     fcout=(wout, bout))
    return out[:N, :D]


# ----------------------------------------------------------------------------
# params / reference
# ----------------------------------------------------------------------------
def init_params(key, input_dim, hidden_dim):
    ks = jax.random.split(key, 5)
    scale = 0.1
    return {
        "eps0": jnp.zeros((1, 1), jnp.float32),   # nn.Parameter(torch.tensor(0.0))
        "eps1": jnp.zeros((1, 1), jnp.float32),
        "w1": scale * jax.random.normal(ks[0], (input_dim, hidden_dim), jnp.float32),
        "b1": jnp.zeros((1, hidden_dim), jnp.float32),
        "w2": scale * jax.random.normal(ks[1], (hidden_dim, hidden_dim), jnp.float32),
        "b2": jnp.zeros((1, hidden_dim), jnp.float32),
        "w3": scale * jax.random.normal(ks[2], (hidden_dim, hidden_dim), jnp.float32),
        "b3": jnp.zeros((1, hidden_dim), jnp.float32),
        "w4": scale * jax.random.normal(ks[3], (hidden_dim, hidden_dim), jnp.float32),
        "b4": jnp.zeros((1, hidden_dim), jnp.float32),
        "wout": scale * jax.random.normal(ks[4], (hidden_dim, input_dim), jnp.float32),
        "bout": jnp.zeros((1, input_dim), jnp.float32),
    }


def ref_forward(x, edge_index, p):
    """Pure-JAX reference mirroring the PyTorch module."""
    src, dst = edge_index[0], edge_index[1]

    def layer(h, eps, w1, b1, w2, b2):
        agg = jnp.zeros_like(h).at[dst].add(h[src])
        u = (1.0 + eps) * h + agg
        return jnp.maximum(u @ w1 + b1, 0.0) @ w2 + b2

    h = layer(x, p["eps0"][0, 0], p["w1"], p["b1"], p["w2"], p["b2"])
    h = layer(h, p["eps1"][0, 0], p["w3"], p["b3"], p["w4"], p["b4"])
    return h @ p["wout"] + p["bout"]


if __name__ == "__main__":
    key = jax.random.PRNGKey(0)
    k_x, k_e, k_p = jax.random.split(key, 3)

    N, D, H, E = 8, 4, 32, 16   # nodes, input_dim, hidden_dim, edges
    node_features = jax.random.normal(k_x, (N, D), jnp.float32)
    edge_index = jax.random.randint(k_e, (2, E), 0, N, jnp.int32)
    params = init_params(k_p, D, H)

    out = gin_node_feature_update(node_features, edge_index, params)
    out = jax.block_until_ready(out)

    ref = ref_forward(node_features, edge_index, params)
    assert out.shape == (N, D)
    err = float(jnp.max(jnp.abs(out - ref)))
    assert jnp.allclose(out, ref, atol=1e-3, rtol=1e-3), err
    print("KERNEL_OK")
</pallas_src>

<mosaic_0001>
module attributes {stable_mosaic.version = 11 : i64} {
  func.func @_gin_layer_kernel(%arg0: i32, %arg1: i32, %arg2: memref<128xi32, #tpu.memory_space<smem>>, %arg3: memref<1xi32, #tpu.memory_space<smem>>, %arg4: memref<1xi32, #tpu.memory_space<smem>>, %arg5: memref<1x128xi32, #tpu.memory_space<vmem>>, %arg6: memref<128x128xf32, #tpu.memory_space<vmem>>, %arg7: memref<128x128xf32, #tpu.memory_space<vmem>>, %arg8: memref<1x1xf32, #tpu.memory_space<smem>>, %arg9: memref<128x128xf32, #tpu.memory_space<vmem>>, %arg10: memref<1x128xf32, #tpu.memory_space<vmem>>, %arg11: memref<128x128xf32, #tpu.memory_space<vmem>>, %arg12: memref<1x128xf32, #tpu.memory_space<vmem>>, %arg13: memref<128x128xf32, #tpu.memory_space<vmem>>, %arg14: memref<128x128xf32, #tpu.memory_space<vmem>>, %arg15: memref<128x128xf32, #tpu.memory_space<vmem>>) attributes {dimension_semantics = [#tpu.dimension_semantics<parallel>, #tpu.dimension_semantics<arbitrary>], iteration_bounds = array<i64: 1, 1>, scalar_prefetch = 3 : i64, scratch_operands = 2 : i64, tpu.core_type = #tpu.core_type<tc>, window_params = [{transform_indices = @transform_0, window_bounds = array<i64: 1, 128>}, {pipeline_mode = #tpu.pipeline_mode<synchronous>, transform_indices = @transform_1, window_bounds = array<i64: 128, 128>}, {transform_indices = @transform_2, window_bounds = array<i64: 128, 128>}, {transform_indices = @transform_3, window_bounds = array<i64: 1, 1>}, {pipeline_mode = #tpu.pipeline_mode<synchronous>, transform_indices = @transform_4, window_bounds = array<i64: 128, 128>}, {pipeline_mode = #tpu.pipeline_mode<synchronous>, transform_indices = @transform_5, window_bounds = array<i64: 1, 128>}, {pipeline_mode = #tpu.pipeline_mode<synchronous>, transform_indices = @transform_6, window_bounds = array<i64: 128, 128>}, {pipeline_mode = #tpu.pipeline_mode<synchronous>, transform_indices = @transform_7, window_bounds = array<i64: 1, 128>}, {transform_indices = @transform_8, window_bounds = array<i64: 128, 128>}]} {
    %c0_i32 = arith.constant 0 : i32
    %0 = arith.cmpi eq, %arg1, %c0_i32 : i32
    %1 = arith.extui %0 : i1 to i32
    %c0_i32_0 = arith.constant 0 : i32
    %2 = arith.cmpi ne, %1, %c0_i32_0 : i32
    scf.if %2 {
      %cst = arith.constant 0.000000e+00 : f32
      %15 = vector.broadcast %cst : f32 to vector<128x128xf32>
      %c0 = arith.constant 0 : index
      %c0_4 = arith.constant 0 : index
      %16 = vector.load %arg15[%c0, %c0_4] : memref<128x128xf32, #tpu.memory_space<vmem>>, vector<128x128xf32>
      tpu.vector_store %arg15[%c0, %c0_4], %15 {strides = array<i32>} : memref<128x128xf32, #tpu.memory_space<vmem>>, vector<128x128xf32>,
    } else {
    }
    %3 = arith.index_cast %arg0 : i32 to index
    %4 = memref.load %arg3[%3] : memref<1xi32, #tpu.memory_space<smem>>
    %5 = arith.index_cast %arg0 : i32 to index
    %6 = memref.load %arg4[%5] : memref<1xi32, #tpu.memory_space<smem>>
    %7 = arith.cmpi sge, %arg1, %4 : i32
    %8 = arith.cmpi slt, %arg1, %6 : i32
    %9 = arith.andi %7, %8 : i1
    %10 = arith.extui %9 : i1 to i32
    %c0_i32_1 = arith.constant 0 : i32
    %11 = arith.cmpi ne, %10, %c0_i32_1 : i32
    scf.if %11 {
      %c128_i32 = arith.constant 128 : i32
      %15 = arith.muli %arg1, %c128_i32 : i32
      %c0_i32_4 = arith.constant 0 : i32
      %c128_i32_5 = arith.constant 128 : i32
      %16 = arith.addi %c0_i32_4, %c128_i32_5 : i32
      %c1_i32 = arith.constant 1 : i32
      scf.for %arg16 = %c0_i32_4 to %16 step %c1_i32  : i32 {
        %31 = arith.addi %15, %arg16 : i32
        %32 = arith.index_cast %31 : i32 to index
        %33 = memref.load %arg2[%32] : memref<128xi32, #tpu.memory_space<smem>>
        %34 = arith.index_cast %33 : i32 to index
        %c0_15 = arith.constant 0 : index
        %35 = vector.load %arg6[%34, %c0_15] : memref<128x128xf32, #tpu.memory_space<vmem>>, vector<1x128xf32>
        %36 = arith.index_cast %arg16 : i32 to index
        %c0_16 = arith.constant 0 : index
        %37 = vector.load %arg14[%36, %c0_16] : memref<128x128xf32, #tpu.memory_space<vmem>>, vector<1x128xf32>
        tpu.vector_store %arg14[%36, %c0_16], %35 {strides = array<i32>} : memref<128x128xf32, #tpu.memory_space<vmem>>, vector<1x128xf32>,
      }
      %c128_i32_6 = arith.constant 128 : i32
      %17 = tpu.iota {dimensions = array<i32: 0>} : vector<128x128xi32>
      %c128_i32_7 = arith.constant 128 : i32
      %18 = arith.muli %arg0, %c128_i32_7 : i32
      %19 = vector.broadcast %18 : i32 to vector<128x128xi32>
      %20 = arith.addi %17, %19 : vector<128x128xi32>
      %c0 = arith.constant 0 : index
      %c0_8 = arith.constant 0 : index
      %21 = vector.load %arg5[%c0, %c0_8] : memref<1x128xi32, #tpu.memory_space<vmem>>, vector<1x128xi32>
      %22 = vector.broadcast %21 : vector<1x128xi32> to vector<128x128xi32>
      %23 = arith.cmpi eq, %20, %22 : vector<128x128xi32>
      %24 = arith.extui %23 : vector<128x128xi1> to vector<128x128xi32>
      %25 = arith.sitofp %24 : vector<128x128xi32> to vector<128x128xf32>
      %c0_9 = arith.constant 0 : index
      %c0_10 = arith.constant 0 : index
      %26 = vector.load %arg15[%c0_9, %c0_10] : memref<128x128xf32, #tpu.memory_space<vmem>>, vector<128x128xf32>
      %c0_11 = arith.constant 0 : index
      %c0_12 = arith.constant 0 : index
      %27 = vector.load %arg14[%c0_11, %c0_12] : memref<128x128xf32, #tpu.memory_space<vmem>>, vector<128x128xf32>
      %cst = arith.constant dense<0.000000e+00> : vector<128x128xf32>
      %28 = tpu.matmul %25, %27, %cst {dimension_numbers = #tpu.dot_dimension_numbers<[1], [0], [0], [1], [0, 0, 1, 1], [], []>} : vector<128x128xf32>, vector<128x128xf32>, vector<128x128xf32> -> vector<128x128xf32>
      %29 = arith.addf %26, %28 : vector<128x128xf32>
      %c0_13 = arith.constant 0 : index
      %c0_14 = arith.constant 0 : index
      %30 = vector.load %arg15[%c0_13, %c0_14] : memref<128x128xf32, #tpu.memory_space<vmem>>, vector<128x128xf32>
      tpu.vector_store %arg15[%c0_13, %c0_14], %29 {strides = array<i32>} : memref<128x128xf32, #tpu.memory_space<vmem>>, vector<128x128xf32>,
    } else {
    }
    %c0_i32_2 = arith.constant 0 : i32
    %12 = arith.cmpi eq, %arg1, %c0_i32_2 : i32
    %13 = arith.extui %12 : i1 to i32
    %c0_i32_3 = arith.constant 0 : i32
    %14 = arith.cmpi ne, %13, %c0_i32_3 : i32
    scf.if %14 {
      %c0 = arith.constant 0 : index
      %c0_4 = arith.constant 0 : index
      %15 = memref.load %arg8[%c0, %c0_4] : memref<1x1xf32, #tpu.memory_space<smem>>
      %cst = arith.constant 1.000000e+00 : f32
      %16 = arith.addf %cst, %15 : f32
      %c0_5 = arith.constant 0 : index
      %c0_6 = arith.constant 0 : index
      %17 = vector.load %arg7[%c0_5, %c0_6] : memref<128x128xf32, #tpu.memory_space<vmem>>, vector<128x128xf32>
      %18 = vector.broadcast %16 : f32 to vector<128x128xf32>
      %19 = arith.mulf %18, %17 : vector<128x128xf32>
      %c0_7 = arith.constant 0 : index
      %c0_8 = arith.constant 0 : index
      %20 = vector.load %arg15[%c0_7, %c0_8] : memref<128x128xf32, #tpu.memory_space<vmem>>, vector<128x128xf32>
      %21 = arith.addf %19, %20 : vector<128x128xf32>
      %c0_9 = arith.constant 0 : index
      %c0_10 = arith.constant 0 : index
      %22 = vector.load %arg9[%c0_9, %c0_10] : memref<128x128xf32, #tpu.memory_space<vmem>>, vector<128x128xf32>
      %cst_11 = arith.constant dense<0.000000e+00> : vector<128x128xf32>
      %23 = tpu.matmul %21, %22, %cst_11 {dimension_numbers = #tpu.dot_dimension_numbers<[1], [0], [0], [1], [0, 0, 1, 1], [], []>} : vector<128x128xf32>, vector<128x128xf32>, vector<128x128xf32> -> vector<128x128xf32>
      %c0_12 = arith.constant 0 : index
      %c0_13 = arith.constant 0 : index
      %24 = vector.load %arg10[%c0_12, %c0_13] : memref<1x128xf32, #tpu.memory_space<vmem>>, vector<1x128xf32>
      %25 = vector.broadcast %24 : vector<1x128xf32> to vector<128x128xf32>
      %26 = arith.addf %23, %25 : vector<128x128xf32>
      %cst_14 = arith.constant 0.000000e+00 : f32
      %27 = vector.broadcast %cst_14 : f32 to vector<128x128xf32>
      %28 = arith.maximumf %26, %27 : vector<128x128xf32>
      %c0_15 = arith.constant 0 : index
      %c0_16 = arith.constant 0 : index
      %29 = vector.load %arg11[%c0_15, %c0_16] : memref<128x128xf32, #tpu.memory_space<vmem>>, vector<128x128xf32>
      %cst_17 = arith.constant dense<0.000000e+00> : vector<128x128xf32>
      %30 = tpu.matmul %28, %29, %cst_17 {dimension_numbers = #tpu.dot_dimension_numbers<[1], [0], [0], [1], [0, 0, 1, 1], [], []>} : vector<128x128xf32>, vector<128x128xf32>, vector<128x128xf32> -> vector<128x128xf32>
      %c0_18 = arith.constant 0 : index
      %c0_19 = arith.constant 0 : index
      %31 = vector.load %arg12[%c0_18, %c0_19] : memref<1x128xf32, #tpu.memory_space<vmem>>, vector<1x128xf32>
      %32 = vector.broadcast %31 : vector<1x128xf32> to vector<128x128xf32>
      %33 = arith.addf %30, %32 : vector<128x128xf32>
      %c0_20 = arith.constant 0 : index
      %c0_21 = arith.constant 0 : index
      %34 = vector.load %arg13[%c0_20, %c0_21] : memref<128x128xf32, #tpu.memory_space<vmem>>, vector<128x128xf32>
      tpu.vector_store %arg13[%c0_20, %c0_21], %33 {strides = array<i32>} : memref<128x128xf32, #tpu.memory_space<vmem>>, vector<128x128xf32>,
    } else {
    }
    return
  }
  func.func @transform_0(%arg0: i32, %arg1: i32, %arg2: memref<128xi32, #tpu.memory_space<smem>>, %arg3: memref<1xi32, #tpu.memory_space<smem>>, %arg4: memref<1xi32, #tpu.memory_space<smem>>) -> (i32, i32) {
    %0 = arith.index_cast %arg0 : i32 to index
    %1 = memref.load %arg3[%0] : memref<1xi32, #tpu.memory_space<smem>>
    %2 = arith.index_cast %arg0 : i32 to index
    %3 = memref.load %arg4[%2] : memref<1xi32, #tpu.memory_space<smem>>
    %c1_i32 = arith.constant 1 : i32
    %4 = arith.subi %3, %c1_i32 : i32
    %5 = arith.maxsi %1, %4 : i32
    %6 = arith.index_cast %arg0 : i32 to index
    %7 = memref.load %arg3[%6] : memref<1xi32, #tpu.memory_space<smem>>
    %8 = arith.maxsi %7, %arg1 : i32
    %9 = arith.minsi %5, %8 : i32
    %c0_i32 = arith.constant 0 : i32
    %c0_i32_0 = arith.constant 0 : i32
    return %c0_i32, %9 : i32, i32
  }
  func.func @transform_1(%arg0: i32, %arg1: i32, %arg2: memref<128xi32, #tpu.memory_space<smem>>, %arg3: memref<1xi32, #tpu.memory_space<smem>>, %arg4: memref<1xi32, #tpu.memory_space<smem>>) -> (i32, i32) {
    %c0_i32 = arith.constant 0 : i32
    %c0_i32_0 = arith.constant 0 : i32
    %c0_i32_1 = arith.constant 0 : i32
    return %c0_i32, %c0_i32_0 : i32, i32
  }
  func.func @transform_2(%arg0: i32, %arg1: i32, %arg2: memref<128xi32, #tpu.memory_space<smem>>, %arg3: memref<1xi32, #tpu.memory_space<smem>>, %arg4: memref<1xi32, #tpu.memory_space<smem>>) -> (i32, i32) {
    %c0_i32 = arith.constant 0 : i32
    %c0_i32_0 = arith.constant 0 : i32
    return %arg0, %c0_i32 : i32, i32
  }
  func.func @transform_3(%arg0: i32, %arg1: i32, %arg2: memref<128xi32, #tpu.memory_space<smem>>, %arg3: memref<1xi32, #tpu.memory_space<smem>>, %arg4: memref<1xi32, #tpu.memory_space<smem>>) -> (i32, i32) {
    %c0_i32 = arith.constant 0 : i32
    %c0_i32_0 = arith.constant 0 : i32
    %c0_i32_1 = arith.constant 0 : i32
    return %c0_i32, %c0_i32_0 : i32, i32
  }
  func.func @transform_4(%arg0: i32, %arg1: i32, %arg2: memref<128xi32, #tpu.memory_space<smem>>, %arg3: memref<1xi32, #tpu.memory_space<smem>>, %arg4: memref<1xi32, #tpu.memory_space<smem>>) -> (i32, i32) {
    %c0_i32 = arith.constant 0 : i32
    %c0_i32_0 = arith.constant 0 : i32
    %c0_i32_1 = arith.constant 0 : i32
    return %c0_i32, %c0_i32_0 : i32, i32
  }
  func.func @transform_5(%arg0: i32, %arg1: i32, %arg2: memref<128xi32, #tpu.memory_space<smem>>, %arg3: memref<1xi32, #tpu.memory_space<smem>>, %arg4: memref<1xi32, #tpu.memory_space<smem>>) -> (i32, i32) {
    %c0_i32 = arith.constant 0 : i32
    %c0_i32_0 = arith.constant 0 : i32
    %c0_i32_1 = arith.constant 0 : i32
    return %c0_i32, %c0_i32_0 : i32, i32
  }
  func.func @transform_6(%arg0: i32, %arg1: i32, %arg2: memref<128xi32, #tpu.memory_space<smem>>, %arg3: memref<1xi32, #tpu.memory_space<smem>>, %arg4: memref<1xi32, #tpu.memory_space<smem>>) -> (i32, i32) {
    %c0_i32 = arith.constant 0 : i32
    %c0_i32_0 = arith.constant 0 : i32
    %c0_i32_1 = arith.constant 0 : i32
    return %c0_i32, %c0_i32_0 : i32, i32
  }
  func.func @transform_7(%arg0: i32, %arg1: i32, %arg2: memref<128xi32, #tpu.memory_space<smem>>, %arg3: memref<1xi32, #tpu.memory_space<smem>>, %arg4: memref<1xi32, #tpu.memory_space<smem>>) -> (i32, i32) {
    %c0_i32 = arith.constant 0 : i32
    %c0_i32_0 = arith.constant 0 : i32
    %c0_i32_1 = arith.constant 0 : i32
    return %c0_i32, %c0_i32_0 : i32, i32
  }
  func.func @transform_8(%arg0: i32, %arg1: i32, %arg2: memref<128xi32, #tpu.memory_space<smem>>, %arg3: memref<1xi32, #tpu.memory_space<smem>>, %arg4: memref<1xi32, #tpu.memory_space<smem>>) -> (i32, i32) {
    %c0_i32 = arith.constant 0 : i32
    %c0_i32_0 = arith.constant 0 : i32
    return %arg0, %c0_i32 : i32, i32
  }
}

</mosaic_0001>

<bundles_post_ra>
// kernel: tpu_custom_call.1
= control target key start
LH: loop header
LB: loop body
LE: loop exit
PB: predicated region body
PF: predicated region fallthrough
CT: control target
= control target key end

     0   :  { %s1811_s0 = inlined_call_operand.vmem [shape: s32[128], index: 0, kind: input, shape index: {}]   ;;  %s1812_s1 = inlined_call_operand.<no memory space> [shape: s32[1], index: 1, kind: input, shape index: {}]   ;;  %s1813_s2 = inlined_call_operand.<no memory space> [shape: s32[1], index: 2, kind: input, shape index: {}]   ;;  %s1814_s3 = inlined_call_operand.vmem [shape: s32[1,128], index: 3, kind: input, shape index: {}]   ;;  %s1815_s4 = inlined_call_operand.hbm [shape: f32[128,128], index: 4, kind: input, shape index: {}]   ;;  %s1816_s5 = inlined_call_operand.hbm [shape: f32[128,128], index: 5, kind: input, shape index: {}]   ;;  %s1817_s6 = inlined_call_operand.<no memory space> [shape: f32[1,1], index: 6, kind: input, shape index: {}]   ;;  %s1818_s7 = inlined_call_operand.hbm [shape: f32[128,128], index: 7, kind: input, shape index: {}]   ;;  %s1819_s8 = inlined_call_operand.vmem [shape: f32[1,128], index: 8, kind: input, shape index: {}]   ;;  %s1820_s9 = inlined_call_operand.hbm [shape: f32[128,128], index: 9, kind: input, shape index: {}]   ;;  %s1821_s10 = inlined_call_operand.vmem [shape: f32[1,128], index: 10, kind: input, shape index: {}]   ;;  %s1822_s11 = inlined_call_operand.hbm [shape: f32[128,128], index: 11, kind: output, shape index: {}]  }
   0x1   :  { %s16_s19 = sshll.u32 %s1811_s0, 4  ;;  %22 = sst [smem:[#allocation8]] %s1817_s6  ;;  %s17_s19 = int_to_ptr.vmem [resolvable:$true] %s16_s19 }
   0x2   :  { %s1388_s22 = scalar_lea.vmem %s17_s19, 16  ;;  %p1393_p1 = scmp.lt.s32.totalorder %s17_s19, %s17_s19 }
   0x3   :  { %p1389_p0 = scmp.ne.s32.totalorder %s17_s19, %s1388_s22  ;;  %p1394_p2 = scmp.lt.s32.totalorder %s1388_s22, %s1388_s22 }
   0x5   :  { %p1395_p3 = por %p1394_p2, %p1393_p1 }
   0x7   :  { %p1396_p4 = pnand %p1395_p3, %p1389_p0 }
   0x9   :  { %1399 = shalt.err (!%p1396_p4)  }
   0xa   :  { %s1528_s23 = smov [#allocation5]  }
   0xb   :  { %19 = dma.vmem_to_smem %s17_s19, 16, %s1528_s23, [#allocation4] }
   0xc   :  { %1514 = dma.done.wait [#allocation4], 16 }
   0xd   :  { %1515 = vsyncadd [#allocation4], 4294967280 }
   0xe   :  { %24 = sfence }
   0xf   :  { %25 = vsyncpa [#allocation10], 0 }
  0x10   :  { %26 = vsyncpa [#allocation13], 0 }
  0x11   :  { %27 = vsyncpa [#allocation16], 0 }
  0x12   :  { %28 = vsyncpa [#allocation11], 0  ;;  %s1529_s0 = smov [#allocation12]   ;;  %s1530_s6 = smov [#allocation9]  }
  0x13   :  { %s69_s24 = sshll.u32 %s1529_s0, 4  ;;  %s57_s25 = sshll.u32 %s1530_s6, 4  ;;  %s70_s24 = int_to_ptr.vmem [resolvable:$true] %s69_s24  ;;  %s1604_s25 = int_to_ptr.vmem [resolvable:$true] %s57_s25 }
  0x14   :  { %s1400_s28 = scalar_lea.hbm %s1816_s5, 2048 }
  0x15   :  { %p1401_p5 = scmp.ne.s32.totalorder %s1816_s5, %s1400_s28  ;;  %p1404_p6 = scmp.lt.u32.totalorder %s1400_s28, %s1816_s5 }
  0x17   :  { %p1406_p7 = pnand %p1404_p6, %p1401_p5 }
  0x19   :  { %1409 = shalt.err (!%p1406_p7)
}
  0x1a   :  { %s1410_s14 = scalar_lea.vmem %s70_s24, 2048  ;;  %p1415_p9 = scmp.lt.s32.totalorder %s70_s24, %s70_s24 }
  0x1b   :  { %p1411_p8 = scmp.ne.s32.totalorder %s70_s24, %s1410_s14  ;;  %p1416_p10 = scmp.lt.s32.totalorder %s1410_s14, %s1410_s14 }
  0x1d   :  { %p1417_p11 = por %p1416_p10, %p1415_p9 }
  0x1f   :  { %p1418_p12 = pnand %p1417_p11, %p1411_p8 }
  0x21   :  { %1421 = shalt.err (!%p1418_p12)
}
  0x22   :  { %s1531_s15 = smov 128   ;;  %s1532_s16 = smov 8  }
  0x23   :  { %75 = dma.hbm_to_vmem [thread:$0]  %s1816_s5, 2048, %s70_s24, [#allocation13], %s1531_s15, %s1531_s15, %s1532_s16  }
  0x24   :  { %s1422_s21 = scalar_lea.hbm %s1815_s4, 2048 }
  0x25   :  { %p1423_p13 = scmp.ne.s32.totalorder %s1815_s4, %s1422_s21  ;;  %p1426_p0 = scmp.lt.u32.totalorder %s1422_s21, %s1815_s4 }
  0x27   :  { %p1428_p1 = pnand %p1426_p0, %p1423_p13 }
  0x29   :  { %1431 = shalt.err (!%p1428_p1)
}
  0x2a   :  { %s1432_s26 = scalar_lea.vmem %s1604_s25, 2048  ;;  %p1437_p3 = scmp.lt.s32.totalorder %s1604_s25, %s1604_s25 }
  0x2b   :  { %p1433_p2 = scmp.ne.s32.totalorder %s1604_s25, %s1432_s26  ;;  %p1438_p4 = scmp.lt.s32.totalorder %s1432_s26, %s1432_s26 }
  0x2d   :  { %p1439_p5 = por %p1438_p4, %p1437_p3 }
  0x2f   :  { %p1440_p6 = pnand %p1439_p5, %p1433_p2 }
  0x31   :  { %1443 = shalt.err (!%p1440_p6)
}
  0x32   :  { %63 = dma.hbm_to_vmem [thread:$0]  %s1815_s4, 2048, %s1604_s25, [#allocation10], %s1531_s15, %s1531_s15, %s1532_s16  }
  0x33   :  { %s1533_s27 = smov [#allocation14]   ;;  %s1534_s29 = smov [#allocation15]  }
  0x34   :  { %s83_s28 = sshll.u32 %s1533_s27, 4  ;;  %s97_s30 = sshll.u32 %s1534_s29, 4  ;;  %s84_s28 = int_to_ptr.vmem [resolvable:$true] %s83_s28  ;;  %s1641_s30 = int_to_ptr.vmem [resolvable:$true] %s97_s30 }
  0x35   :  { %s1444_s14 = scalar_lea.hbm %s1818_s7, 2048 }
  0x36   :  { %p1445_p7 = scmp.ne.s32.totalorder %s1818_s7, %s1444_s14  ;;  %p1448_p8 = scmp.lt.u32.totalorder %s1444_s14, %s1818_s7 }
  0x38   :  { %p1450_p9 = pnand %p1448_p8, %p1445_p7 }
  0x3a   :  { %1453 = shalt.err (!%p1450_p9)
}
  0x3b   :  { %s1454_s4 = scalar_lea.vmem %s84_s28, 2048  ;;  %p1459_p11 = scmp.lt.s32.totalorder %s84_s28, %s84_s28 }
  0x3c   :  { %p1455_p10 = scmp.ne.s32.totalorder %s84_s28, %s1454_s4  ;;  %p1460_p12 = scmp.lt.s32.totalorder %s1454_s4, %s1454_s4 }
  0x3e   :  { %p1461_p13 = por %p1460_p12, %p1459_p11 }
  0x40   :  { %p1462_p0 = pnand %p1461_p13, %p1455_p10 }
  0x42   :  { %1465 = shalt.err (!%p1462_p0)
}
  0x43   :  { %89 = dma.hbm_to_vmem [thread:$0]  %s1818_s7, 2048, %s84_s28, [#allocation13], %s1531_s15, %s1531_s15, %s1532_s16  }
  0x44   :  { %s1466_s0 = scalar_lea.hbm %s1820_s9, 2048 }
  0x45   :  { %p1467_p1 = scmp.ne.s32.totalorder %s1820_s9, %s1466_s0  ;;  %p1470_p2 = scmp.lt.u32.totalorder %s1466_s0, %s1820_s9 }
  0x47   :  { %p1472_p3 = pnand %p1470_p2, %p1467_p1 }
  0x49   :  { %1475 = shalt.err (!%p1472_p3)
}
  0x4a   :  { %s1476_s27 = scalar_lea.vmem %s1641_s30, 2048  ;;  %p1481_p5 = scmp.lt.s32.totalorder %s1641_s30, %s1641_s30 }
  0x4b   :  { %p1477_p4 = scmp.ne.s32.totalorder %s1641_s30, %s1476_s27  ;;  %p1482_p6 = scmp.lt.s32.totalorder %s1476_s27, %s1476_s27 }
  0x4d   :  { %p1483_p7 = por %p1482_p6, %p1481_p5 }
  0x4f   :  { %p1484_p8 = pnand %p1483_p7, %p1477_p4 }
  0x51   :  { %1487 = shalt.err (!%p1484_p8)
}
  0x52   :  { %103 = dma.hbm_to_vmem [thread:$0]  %s1820_s9, 2048, %s1641_s30, [#allocation16], %s1531_s15, %s1531_s15, %s1532_s16  }
  0x53   :  { %1516 = dma.done.wait [#allocation10], 2048  }
  0x54   :  { %1517 = vsyncadd [#allocation10], 4294965248 }
  0x55   :  { %1518 = dma.done.wait [#allocation13], 4096  }
  0x56   :  { %1519 = vsyncadd [#allocation13], 4294963200 }
  0x57   :  { %1520 = dma.done.wait [#allocation16], 2048  }
  0x58   :  { %1521 = vsyncadd [#allocation16], 4294965248  ;;  %s956_s13 = sadd.s32 4294967295, %s1813_s2  ;;  %p135_p9 = scmp.gt.s32.totalorder %s1812_s1, 0  ;;  %v1535_v0 = vmov 0.0  }
  0x59   :  { %p1687_p10 = scmp.gt.s32.totalorder %s1812_s1, %s956_s13  ;;  %155 = vst [vmem:[#allocation3] sm:$0xff] %v1535_v0  ;;  %156 = vst [vmem:[#allocation3 + $0x8] sm:$0xff] %v1535_v0  ;;  %p957_p11 = scmp.le.s32.totalorder %s1812_s1, 0 }
  0x5a   :  { %157 = vst [vmem:[#allocation3 + $0x10] sm:$0xff] %v1535_v0  ;;  %158 = vst [vmem:[#allocation3 + $0x18] sm:$0xff] %v1535_v0  ;;  %s136_s23 = scalar_select %p135_p9, %s1812_s1, 0 }
  0x5b   :  { %159 = vst [vmem:[#allocation3 + $0x20] sm:$0xff] %v1535_v0  ;;  %160 = vst [vmem:[#allocation3 + $0x28] sm:$0xff] %v1535_v0  ;;  %s1825_s1 = smov (!%p1687_p10, %s1812_s1), %s956_s13  ;;  %p958_p12 = scmp.gt.s32.totalorder %s1813_s2, 0 }
  0x5c   :  { %161 = vst [vmem:[#allocation3 + $0x30] sm:$0xff] %v1535_v0  ;;  %162 = vst [vmem:[#allocation3 + $0x38] sm:$0xff] %v1535_v0  ;;  %p137_p13 = scmp.lt.s32.totalorder %s1825_s1, %s136_s23 }
  0x5d   :  { %163 = vst [vmem:[#allocation3 + $0x40] sm:$0xff] %v1535_v0  ;;  %164 = vst [vmem:[#allocation3 + $0x48] sm:$0xff] %v1535_v0  ;;  %p175_p0 = pnand %p958_p12, %p957_p11 }
  0x5e   :  { %165 = vst [vmem:[#allocation3 + $0x50] sm:$0xff] %v1535_v0  ;;  %166 = vst [vmem:[#allocation3 + $0x58] sm:$0xff] %v1535_v0  ;;  %s1827_s1 = smov (!%p137_p13, %s1825_s1), %s136_s23  ;;  %s1524_s28 = smov (!%p175_p0), 0  }
  0x5f   :  { %167 = vst [vmem:[#allocation3 + $0x60] sm:$0xff] %v1535_v0  ;;  %168 = vst [vmem:[#allocation3 + $0x68] sm:$0xff] %v1535_v0  ;;  %p139_p1 = scmp.lt.s32.totalorder %s1827_s1, 0  ;;  %178 = sbr.rel (%p175_p0) target bundleno = 380 (0x17c), region = 57 }
  0x60   :  { %169 = vst [vmem:[#allocation3 + $0x70] sm:$0xff] %v1535_v0  ;;  %170 = vst [vmem:[#allocation3 + $0x78] sm:$0xff] %v1535_v0 }
  0x61   :  { %s1829_s1 = smov (!%p139_p1, %s1827_s1), 0 }
  0x62   :  { %s141_s7 = scalar_lea.vmem %s1814_s3, %s1829_s1 }
  0x66 LB: > { %s187_s29 = sld [smem:[#allocation5 + %s1526_s28]]  ;;  %s190_s2 = scalar_lea.vmem [#allocation2], %s1526_s28  ;;  %s1526_s28 = sphi %s1524_s28, %s185_s28  }
  0x67   : > { %s185_s28 = sadd.s32 1, %s1526_s28  }
  0x68   : > { %p182_p2 = scmp.ge.s32.totalorder %s185_s28, 128  }
  0x69   :  { %v192_v5 = vlaneseq (%p182_p2)  ;;  %v1723_v14 = vld [vmem:[%s141_s7] ss:$0 sm:$0xff] (%p182_p2)  ;;  %v1536_v17 = vmov (%p182_p2), 1.0   ;;  %v281_v45 = vld [vmem:[#allocation3 + $0x8] sm:$0xff] (%p182_p2)  ;;  %v283_v57 = vld [vmem:[#allocation3 + $0x18] sm:$0xff] (%p182_p2) }
  0x6a   :  { %184 = sbr.rel (!%p182_p2) target bundleno = 102 (0x66), region = 92  ;;  %v289_v46 = vld [vmem:[#allocation3 + $0x48] sm:$0xff] (%p182_p2)  ;;  %v280_v47 = vld [vmem:[#allocation3] sm:$0xff] (%p182_p2)  ;;  %v291_v58 = vld [vmem:[#allocation3 + $0x58] sm:$0xff] (%p182_p2) }
  0x6b   :  { %v1715_v11 = vshrl.u32 (%p182_p2), %v192_v5, 7  ;;  %v288_v48 = vld [vmem:[#allocation3 + $0x40] sm:$0xff] (%p182_p2)  ;;  %v282_v59 = vld [vmem:[#allocation3 + $0x10] sm:$0xff] (%p182_p2)  ;;  %v285_v5 = vld [vmem:[#allocation3 + $0x28] sm:$0xff] (%p182_p2) }
  0x6c   : > { %s188_s12 = scalar_lea.vmem [#allocation9], %s187_s29  ;;  %v290_v60 = vld [vmem:[#allocation3 + $0x50] sm:$0xff] (%p182_p2) }
  0x6d   : > { %v189_v1 = vld [vmem:[%s188_s12] sm:$0x1]  ;;  %v201_v12 = vadd.s32 (%p182_p2), 64, %v1715_v11  ;;  %vm232_vm0 = vcmp.eq.s32.totalorder (%p182_p2), %v1715_v11, %v1723_v14  ;;  %v194_v31 = vadd.s32 (%p182_p2), 8, %v1715_v11  ;;  %v202_v32 = vadd.s32 (%p182_p2), 72, %v1715_v11 }
  0x6e   : > { %191 = vst [vmem:[%s190_s2] sm:$0x1] %v189_v1  ;;  %1122 = vmatprep.mubr.msk.f32.mxu0 (%p182_p2), %vm232_vm0, %v1536_v17  ;;  %v195_v33 = vadd.s32 (%p182_p2), 16, %v1715_v11  ;;  %v203_v34 = vadd.s32 (%p182_p2), 80, %v1715_v11  ;;  %v196_v35 = vadd.s32 (%p182_p2), 24, %v1715_v11  ;;  %v204_v36 = vadd.s32 (%p182_p2), 88, %v1715_v11 }
  0x6f   :  { %vm240_vm1 = vcmp.eq.s32.totalorder (%p182_p2), %v201_v12, %v1723_v14  ;;  %vm233_vm2 = vcmp.eq.s32.totalorder (%p182_p2), %v194_v31, %v1723_v14  ;;  %vm241_vm3 = vcmp.eq.s32.totalorder (%p182_p2), %v202_v32, %v1723_v14  ;;  %v197_v37 = vadd.s32 (%p182_p2), 32, %v1715_v11 }
  0x70   :  { %1134 = vmatprep.mubr.msk.f32.mxu1 (%p182_p2), %vm240_vm1, %v1536_v17  ;;  %vm234_vm4 = vcmp.eq.s32.totalorder (%p182_p2), %v195_v33, %v1723_v14  ;;  %vm242_vm5 = vcmp.eq.s32.totalorder (%p182_p2), %v203_v34, %v1723_v14  ;;  %v205_v38 = vadd.s32 (%p182_p2), 96, %v1715_v11  ;;  %vm235_vm6 = vcmp.eq.s32.totalorder (%p182_p2), %v196_v35, %v1723_v14 }
  0x71   :  { %vm243_vm7 = vcmp.eq.s32.totalorder %v204_v36, %v1723_v14  ;;  %v198_v39 = vadd.s32 40, %v1715_v11  ;;  %v206_v40 = vadd.s32 104, %v1715_v11  ;;  %vm236_vm8 = vcmp.eq.s32.totalorder %v197_v37, %v1723_v14 }
  0x72   :  { %vm244_vm9 = vcmp.eq.s32.totalorder %v205_v38, %v1723_v14  ;;  %v199_v41 = vadd.s32 48, %v1715_v11  ;;  %v207_v42 = vadd.s32 112, %v1715_v11  ;;  %v200_v43 = vadd.s32 56, %v1715_v11 }
  0x73   :  { %vm237_vm10 = vcmp.eq.s32.totalorder %v198_v39, %v1723_v14  ;;  %vm245_vm11 = vcmp.eq.s32.totalorder %v206_v40, %v1723_v14  ;;  %v208_v44 = vadd.s32 120, %v1715_v11 }
  0x74   :  { %vm238_vm12 = vcmp.eq.s32.totalorder %v199_v41, %v1723_v14  ;;  %vm246_vm13 = vcmp.eq.s32.totalorder %v207_v42, %v1723_v14  ;;  %vm239_vm14 = vcmp.eq.s32.totalorder %v200_v43, %v1723_v14 }
  0x75   :  { %v296_v2 = vld [vmem:[#allocation2] sm:$0xff]  ;;  %v297_v3 = vld [vmem:[#allocation2 + $0x8] sm:$0xff]  ;;  %v298_v4 = vld [vmem:[#allocation2 + $0x10] sm:$0xff]  ;;  %vm247_vm15 = vcmp.eq.s32.totalorder %v208_v44, %v1723_v14 }
  0x76   :  { %v1258_v6 = vpack.c.bf16 %v297_v3, %v296_v2  ;;  %v299_v7 = vld [vmem:[#allocation2 + $0x18] sm:$0xff]  ;;  %v300_v9 = vld [vmem:[#allocation2 + $0x20] sm:$0xff]  ;;  %v301_v10 = vld [vmem:[#allocation2 + $0x28] sm:$0xff] }
  0x77   :  { %v1262_v8 = vpack.c.bf16 %v299_v7, %v298_v4  ;;  %v1266_v13 = vpack.c.bf16 %v301_v10, %v300_v9  ;;  %v302_v15 = vld [vmem:[#allocation2 + $0x30] sm:$0xff]  ;;  %v303_v16 = vld [vmem:[#allocation2 + $0x38] sm:$0xff]  ;;  %v304_v19 = vld [vmem:[#allocation2 + $0x40] sm:$0xff] }
  0x78   :  { %1259 = vmatprep.subr.bf16.mxu0 %v1258_v6  ;;  %1354 = vmatprep.subr.bf16.mxu1 %v1258_v6  ;;  %v1270_v18 = vpack.c.bf16 %v303_v16, %v302_v15  ;;  %v305_v20 = vld [vmem:[#allocation2 + $0x48] sm:$0xff]  ;;  %v306_v22 = vld [vmem:[#allocation2 + $0x50] sm:$0xff]  ;;  %v307_v23 = vld [vmem:[#allocation2 + $0x58] sm:$0xff] }
  0x79   :  { %1261 = vmatpush3.bf16.msra.mxu0 %v1258_v6  ;;  %1362 = vmatpush3.bf16.msra.mxu1 %v1258_v6  ;;  %v1274_v21 = vpack.c.bf16 %v305_v20, %v304_v19  ;;  %v1278_v24 = vpack.c.bf16 %v307_v23, %v306_v22  ;;  %v308_v25 = vld [vmem:[#allocation2 + $0x60] sm:$0xff]  ;;  %v309_v26 = vld [vmem:[#allocation2 + $0x68] sm:$0xff]  ;;  %v310_v28 = vld [vmem:[#allocation2 + $0x70] sm:$0xff] }
  0x7a   :  { %1263 = vmatprep.subr.bf16.mxu0 %v1262_v8  ;;  %1355 = vmatprep.subr.bf16.mxu1 %v1262_v8  ;;  %v1282_v27 = vpack.c.bf16 %v309_v26, %v308_v25  ;;  %v311_v29 = vld [vmem:[#allocation2 + $0x78] sm:$0xff]  ;;  %v293_v6 = vld [vmem:[#allocation3 + $0x68] sm:$0xff]  ;;  %v284_v7 = vld [vmem:[#allocation3 + $0x20] sm:$0xff] }
  0x7b   :  { %v1286_v30 = vpack.c.bf16 %v311_v29, %v310_v28  ;;  %v286_v19 = vld [vmem:[#allocation3 + $0x30] sm:$0xff] }
  0x7c   :  { %v294_v20 = vld [vmem:[#allocation3 + $0x70] sm:$0xff] }
  0x7d   :  { %1265 = vmatpush3.bf16.msra.mxu0 %v1262_v8  ;;  %1363 = vmatpush3.bf16.msra.mxu1 %v1262_v8  ;;  %v292_v8 = vld [vmem:[#allocation3 + $0x60] sm:$0xff] }
  0x7e   :  { %1267 = vmatprep.subr.bf16.mxu0 %v1266_v13  ;;  %1356 = vmatprep.subr.bf16.mxu1 %v1266_v13 }
  0x81   :  { %1269 = vmatpush3.bf16.msra.mxu0 %v1266_v13  ;;  %1364 = vmatpush3.bf16.msra.mxu1 %v1266_v13 }
  0x82   :  { %1271 = vmatprep.subr.bf16.mxu0 %v1270_v18  ;;  %1357 = vmatprep.subr.bf16.mxu1 %v1270_v18 }
  0x85   :  { %1273 = vmatpush3.bf16.msra.mxu0 %v1270_v18  ;;  %1365 = vmatpush3.bf16.msra.mxu1 %v1270_v18  ;;  %v295_v18 = vld [vmem:[#allocation3 + $0x78] sm:$0xff] }
  0x86   :  { %1275 = vmatprep.subr.bf16.mxu0 %v1274_v21  ;;  %1358 = vmatprep.subr.bf16.mxu1 %v1274_v21 }
  0x89   :  { %1277 = vmatpush3.bf16.msra.mxu0 %v1274_v21  ;;  %1366 = vmatpush3.bf16.msra.mxu1 %v1274_v21 }
  0x8a   :  { %1279 = vmatprep.subr.bf16.mxu0 %v1278_v24  ;;  %1359 = vmatprep.subr.bf16.mxu1 %v1278_v24 }
  0x8d   :  { %1281 = vmatpush3.bf16.msra.mxu0 %v1278_v24  ;;  %1367 = vmatpush3.bf16.msra.mxu1 %v1278_v24 }
  0x8e   :  { %1283 = vmatprep.subr.bf16.mxu0 %v1282_v27  ;;  %1360 = vmatprep.subr.bf16.mxu1 %v1282_v27 }
  0x91   :  { %1285 = vmatpush3.bf16.msra.mxu0 %v1282_v27  ;;  %1368 = vmatpush3.bf16.msra.mxu1 %v1282_v27 }
  0x92   :  { %1287 = vmatprep.subr.bf16.mxu0 %v1286_v30  ;;  %1361 = vmatprep.subr.bf16.mxu1 %v1286_v30 }
  0x95   :  { %1289 = vmatpush3.bf16.msra.mxu0 %v1286_v30  ;;  %1369 = vmatpush3.bf16.msra.mxu1 %v1286_v30 }
  0x98   :  { %1123 = vmatmul.mubr.msk.f32.vlgmr.msra.gmra.mrb[0].mxu0 %vm233_vm2, %v1536_v17  ;;  %1135 = vmatmul.mubr.msk.f32.vlgmr.msra.gmra.mrb[0].mxu1 %vm241_vm3, %v1536_v17 }
  0x99   :  { %1125 = vmatprep.mubr.msk.f32.mxu0 %vm234_vm4, %v1536_v17  ;;  %1137 = vmatprep.mubr.msk.f32.mxu1 %vm242_vm5, %v1536_v17 }
  0x9c   :  { %1126 = vmatmul.mubr.msk.f32.gmra.mrb[2].mxu0 %vm235_vm6, %v1536_v17  ;;  %1138 = vmatmul.mubr.msk.f32.gmra.mrb[2].mxu1 %vm243_vm7, %v1536_v17 }
  0x9d   :  { %1128 = vmatprep.mubr.msk.f32.mxu0 %vm236_vm8, %v1536_v17  ;;  %1140 = vmatprep.mubr.msk.f32.mxu1 %vm244_vm9, %v1536_v17 }
  0xa0   :  { %1129 = vmatmul.mubr.msk.f32.gmra.mrb[4].mxu0 %vm237_vm10, %v1536_v17  ;;  %1141 = vmatmul.mubr.msk.f32.gmra.mrb[4].mxu1 %vm245_vm11, %v1536_v17 }
  0xa1   :  { %1131 = vmatprep.mubr.msk.f32.mxu0 %vm238_vm12, %v1536_v17  ;;  %1143 = vmatprep.mubr.msk.f32.mxu1 %vm246_vm13, %v1536_v17 }
  0xa4   :  { %1132 = vmatmul.mubr.msk.f32.gmra.mrb[6].mxu0 %vm239_vm14, %v1536_v17  ;;  %1144 = vmatmul.mubr.msk.f32.gmra.mrb[6].mxu1 %vm247_vm15, %v1536_v17  ;;  %v287_v17 = vld [vmem:[#allocation3 + $0x38] sm:$0xff] }
 0x16b   :  { %v1124_v49 = vpop.f32.mrb[0].mxu0  ;;  %v1136_v50 = vpop.f32.mrb[0].mxu1 }
 0x16c   :  { %v458_v51 = vadd.f32 %v1124_v49, %v281_v45  ;;  %v466_v52 = vadd.f32 %v1136_v50, %v289_v46  ;;  %v378_v53 = vpop.f32.mrb[1].mxu0  ;;  %v418_v54 = vpop.f32.mrb[1].mxu1 }
 0x16d   :  { %v457_v55 = vadd.f32 %v378_v53, %v280_v47  ;;  %v465_v56 = vadd.f32 %v418_v54, %v288_v48 }
 0x16e   :  { %474 = vst [vmem:[#allocation3 + $0x8] sm:$0xff] %v458_v51  ;;  %482 = vst [vmem:[#allocation3 + $0x48] sm:$0xff] %v466_v52 }
 0x16f   :  { %473 = vst [vmem:[#allocation3] sm:$0xff] %v457_v55  ;;  %481 = vst [vmem:[#allocation3 + $0x40] sm:$0xff] %v465_v56  ;;  %v1127_v61 = vpop.f32.mrb[2].mxu0  ;;  %v1139_v62 = vpop.f32.mrb[2].mxu1 }
 0x170   :  { %v460_v63 = vadd.f32 %v1127_v61, %v283_v57  ;;  %v468_v0 = vadd.f32 %v1139_v62, %v291_v58  ;;  %v388_v1 = vpop.f32.mrb[3].mxu0  ;;  %v428_v2 = vpop.f32.mrb[3].mxu1 }
 0x171   :  { %v459_v3 = vadd.f32 %v388_v1, %v282_v59  ;;  %v467_v4 = vadd.f32 %v428_v2, %v290_v60 }
 0x172   :  { %476 = vst [vmem:[#allocation3 + $0x18] sm:$0xff] %v460_v63  ;;  %484 = vst [vmem:[#allocation3 + $0x58] sm:$0xff] %v468_v0 }
 0x173   :  { %475 = vst [vmem:[#allocation3 + $0x10] sm:$0xff] %v459_v3  ;;  %483 = vst [vmem:[#allocation3 + $0x50] sm:$0xff] %v467_v4  ;;  %v1130_v9 = vpop.f32.mrb[4].mxu0  ;;  %v1142_v10 = vpop.f32.mrb[4].mxu1 }
 0x174   :  { %v462_v11 = vadd.f32 %v1130_v9, %v285_v5  ;;  %v470_v12 = vadd.f32 %v1142_v10, %v293_v6  ;;  %v398_v13 = vpop.f32.mrb[5].mxu0  ;;  %v438_v14 = vpop.f32.mrb[5].mxu1 }
 0x175   :  { %v461_v15 = vadd.f32 %v398_v13, %v284_v7  ;;  %v469_v16 = vadd.f32 %v438_v14, %v292_v8 }
 0x176   :  { %478 = vst [vmem:[#allocation3 + $0x28] sm:$0xff] %v462_v11  ;;  %486 = vst [vmem:[#allocation3 + $0x68] sm:$0xff] %v470_v12 }
 0x177   :  { %477 = vst [vmem:[#allocation3 + $0x20] sm:$0xff] %v461_v15  ;;  %485 = vst [vmem:[#allocation3 + $0x60] sm:$0xff] %v469_v16  ;;  %v1133_v21 = vpop.f32.mrb[6].mxu0  ;;  %v1145_v22 = vpop.f32.mrb[6].mxu1 }
 0x178   :  { %v464_v23 = vadd.f32 %v1133_v21, %v287_v17  ;;  %v472_v24 = vadd.f32 %v1145_v22, %v295_v18  ;;  %v408_v25 = vpop.f32.mrb[7].mxu0  ;;  %v448_v26 = vpop.f32.mrb[7].mxu1 }
 0x179   :  { %v463_v27 = vadd.f32 %v408_v25, %v286_v19  ;;  %v471_v28 = vadd.f32 %v448_v26, %v294_v20 }
 0x17a   :  { %480 = vst [vmem:[#allocation3 + $0x38] sm:$0xff] %v464_v23  ;;  %488 = vst [vmem:[#allocation3 + $0x78] sm:$0xff] %v472_v24 }
 0x17b   :  { %479 = vst [vmem:[#allocation3 + $0x30] sm:$0xff] %v463_v27  ;;  %487 = vst [vmem:[#allocation3 + $0x70] sm:$0xff] %v471_v28 }
 0x17c PF:  { %v559_v29 = vld [vmem:[#allocation14] sm:$0xff]  ;;  %v560_v30 = vld [vmem:[#allocation14 + $0x8] sm:$0xff]  ;;  %v561_v31 = vld [vmem:[#allocation14 + $0x10] sm:$0xff]  ;;  %s492_s1 = sld [smem:[#allocation8]] }
 0x17d   :  { %v1290_v32 = vpack.c.bf16 %v560_v30, %v559_v29  ;;  %v562_v33 = vld [vmem:[#allocation14 + $0x18] sm:$0xff]  ;;  %v563_v35 = vld [vmem:[#allocation14 + $0x20] sm:$0xff]  ;;  %v564_v36 = vld [vmem:[#allocation14 + $0x28] sm:$0xff] }
 0x17e   :  { %v1294_v34 = vpack.c.bf16 %v562_v33, %v561_v31  ;;  %v1298_v37 = vpack.c.bf16 %v564_v36, %v563_v35  ;;  %v565_v38 = vld [vmem:[#allocation14 + $0x30] sm:$0xff]  ;;  %v566_v39 = vld [vmem:[#allocation14 + $0x38] sm:$0xff]  ;;  %v494_v40 = vld [vmem:[#allocation12] sm:$0xff] }
 0x17f   :  { %1291 = vmatprep.subr.bf16.mxu0 %v1290_v32  ;;  %v527_v42 = vld [vmem:[#allocation3] sm:$0xff]  ;;  %v1302_v43 = vpack.c.bf16 %v566_v39, %v565_v38  ;;  %v568_v46 = vld [vmem:[#allocation14 + $0x48] sm:$0xff]  ;;  %v569_v49 = vld [vmem:[#allocation14 + $0x50] sm:$0xff] }
 0x180   :  { %1293 = vmatpush3.bf16.msra.mxu0 %v1290_v32  ;;  %v567_v45 = vld [vmem:[#allocation14 + $0x40] sm:$0xff]  ;;  %v570_v50 = vld [vmem:[#allocation14 + $0x58] sm:$0xff]  ;;  %v744_v52 = vld [vmem:[#allocation15 + $0x8] sm:$0xff] }
 0x181   :  { %1295 = vmatprep.subr.bf16.mxu0 %v1294_v34  ;;  %v1306_v48 = vpack.c.bf16 %v568_v46, %v567_v45  ;;  %v743_v51 = vld [vmem:[#allocation15] sm:$0xff]  ;;  %v745_v53 = vld [vmem:[#allocation15 + $0x10] sm:$0xff]  ;;  %v1310_v54 = vpack.c.bf16 %v570_v50, %v569_v49  ;;  %v746_v57 = vld [vmem:[#allocation15 + $0x18] sm:$0xff] }
 0x182   :  { %s493_s3 = sadd.f32 1.0, %s492_s1  ;;  %v571_v55 = vld [vmem:[#allocation14 + $0x60] sm:$0xff]  ;;  %v1322_v56 = vpack.c.bf16 %v744_v52, %v743_v51  ;;  %v572_v58 = vld [vmem:[#allocation14 + $0x68] sm:$0xff]  ;;  %v1326_v59 = vpack.c.bf16 %v746_v57, %v745_v53  ;;  %v573_v63 = vld [vmem:[#allocation14 + $0x70] sm:$0xff] }
 0x183   :  { %v747_v60 = vld [vmem:[#allocation15 + $0x20] sm:$0xff]  ;;  %v748_v61 = vld [vmem:[#allocation15 + $0x28] sm:$0xff]  ;;  %v1314_v62 = vpack.c.bf16 %v572_v58, %v571_v55  ;;  %v574_v1 = vld [vmem:[#allocation14 + $0x78] sm:$0xff] }
 0x184   :  { %1297 = vmatpush3.bf16.msra.mxu0 %v1294_v34  ;;  %v1772_v41 = vstv %s493_s3  ;;  %1323 = vmatprep.subr.bf16.mxu1 %v1322_v56  ;;  %v1330_v0 = vpack.c.bf16 %v748_v61, %v747_v60  ;;  %v749_v2 = vld [vmem:[#allocation15 + $0x30] sm:$0xff]  ;;  %v750_v3 = vld [vmem:[#allocation15 + $0x38] sm:$0xff]  ;;  %v495_v4 = vld [vmem:[#allocation12 + $0x8] sm:$0xff]  ;;  %v1318_v5 = vpack.c.bf16 %v574_v1, %v573_v63 }
 0x185   :  { %1299 = vmatprep.subr.bf16.mxu0 %v1298_v37  ;;  %v511_v44 = vmul.f32 %v1772_v41, %v494_v40  ;;  %1325 = vmatpush3.bf16.msra.mxu1 %v1322_v56  ;;  %v496_v6 = vld [vmem:[#allocation12 + $0x10] sm:$0xff]  ;;  %v1334_v7 = vpack.c.bf16 %v750_v3, %v749_v2  ;;  %v751_v8 = vld [vmem:[#allocation15 + $0x40] sm:$0xff]  ;;  %v752_v9 = vld [vmem:[#allocation15 + $0x48] sm:$0xff]  ;;  %v512_v10 = vmul.f32 %v1772_v41, %v495_v4 }
 0x186   :  { %1327 = vmatprep.subr.bf16.mxu1 %v1326_v59  ;;  %v528_v11 = vld [vmem:[#allocation3 + $0x8] sm:$0xff]  ;;  %v513_v12 = vmul.f32 %v1772_v41, %v496_v6  ;;  %v497_v13 = vld [vmem:[#allocation12 + $0x18] sm:$0xff]  ;;  %v529_v14 = vld [vmem:[#allocation3 + $0x10] sm:$0xff]  ;;  %v1338_v16 = vpack.c.bf16 %v752_v9, %v751_v8 }
 0x187   :  { %v543_v47 = vadd.f32 %v527_v42, %v511_v44  ;;  %v498_v15 = vld [vmem:[#allocation12 + $0x20] sm:$0xff]  ;;  %v753_v17 = vld [vmem:[#allocation15 + $0x50] sm:$0xff]  ;;  %v754_v18 = vld [vmem:[#allocation15 + $0x58] sm:$0xff]  ;;  %v544_v19 = vadd.f32 %v528_v11, %v512_v10  ;;  %v514_v20 = vmul.f32 %v1772_v41, %v497_v13 }
 0x188   :  { %1301 = vmatpush3.bf16.msra.mxu0 %v1298_v37  ;;  %v545_v21 = vadd.f32 %v529_v14, %v513_v12  ;;  %v530_v22 = vld [vmem:[#allocation3 + $0x18] sm:$0xff]  ;;  %v515_v23 = vmul.f32 %v1772_v41, %v498_v15  ;;  %v499_v24 = vld [vmem:[#allocation12 + $0x28] sm:$0xff]  ;;  %v531_v25 = vld [vmem:[#allocation3 + $0x20] sm:$0xff]  ;;  %v1342_v27 = vpack.c.bf16 %v754_v18, %v753_v17 }
 0x189   :  { %1303 = vmatprep.subr.bf16.mxu0 %v1302_v43  ;;  %1178 = vmatprep.mubr.f32.mxu0 %v543_v47  ;;  %v500_v26 = vld [vmem:[#allocation12 + $0x30] sm:$0xff]  ;;  %v755_v28 = vld [vmem:[#allocation15 + $0x60] sm:$0xff]  ;;  %v756_v29 = vld [vmem:[#allocation15 + $0x68] sm:$0xff]  ;;  %v546_v30 = vadd.f32 %v530_v22, %v514_v20  ;;  %v516_v31 = vmul.f32 %v1772_v41, %v499_v24 }
 0x18a   :  { %1329 = vmatpush3.bf16.msra.mxu1 %v1326_v59  ;;  %v547_v32 = vadd.f32 %v531_v25, %v515_v23  ;;  %v532_v33 = vld [vmem:[#allocation3 + $0x28] sm:$0xff]  ;;  %v517_v34 = vmul.f32 %v1772_v41, %v500_v26  ;;  %v501_v35 = vld [vmem:[#allocation12 + $0x38] sm:$0xff]  ;;  %v533_v36 = vld [vmem:[#allocation3 + $0x30] sm:$0xff]  ;;  %v1346_v38 = vpack.c.bf16 %v756_v29, %v755_v28 }
 0x18b   :  { %1331 = vmatprep.subr.bf16.mxu1 %v1330_v0  ;;  %v502_v37 = vld [vmem:[#allocation12 + $0x40] sm:$0xff]  ;;  %v548_v39 = vadd.f32 %v532_v33, %v516_v31  ;;  %v518_v40 = vmul.f32 %v1772_v41, %v501_v35  ;;  %v503_v45 = vld [vmem:[#allocation12 + $0x48] sm:$0xff]  ;;  %v504_v47 = vld [vmem:[#allocation12 + $0x50] sm:$0xff] }
 0x18c   :  { %1305 = vmatpush3.bf16.msra.mxu0 %v1302_v43  ;;  %v549_v42 = vadd.f32 %v533_v36, %v517_v34  ;;  %v534_v43 = vld [vmem:[#allocation3 + $0x38] sm:$0xff]  ;;  %v519_v44 = vmul.f32 %v1772_v41, %v502_v37  ;;  %v535_v46 = vld [vmem:[#allocation3 + $0x40] sm:$0xff]  ;;  %v520_v49 = vmul.f32 %v1772_v41, %v503_v45  ;;  %v536_v51 = vld [vmem:[#allocation3 + $0x48] sm:$0xff]  ;;  %v521_v52 = vmul.f32 %v1772_v41, %v504_v47 }
 0x18d   :  { %1307 = vmatprep.subr.bf16.mxu0 %v1306_v48  ;;  %v505_v53 = vld [vmem:[#allocation12 + $0x58] sm:$0xff]  ;;  %v506_v55 = vld [vmem:[#allocation12 + $0x60] sm:$0xff]  ;;  %v507_v61 = vld [vmem:[#allocation12 + $0x68] sm:$0xff] }
 0x18e   :  { %1333 = vmatpush3.bf16.msra.mxu1 %v1330_v0  ;;  %v551_v50 = vadd.f32 %v535_v46, %v519_v44  ;;  %v552_v56 = vadd.f32 %v536_v51, %v520_v49  ;;  %v522_v57 = vmul.f32 %v1772_v41, %v505_v53  ;;  %v538_v59 = vld [vmem:[#allocation3 + $0x58] sm:$0xff]  ;;  %v523_v60 = vmul.f32 %v1772_v41, %v506_v55  ;;  %v508_v63 = vld [vmem:[#allocation12 + $0x70] sm:$0xff]  ;;  %v540_v3 = vld [vmem:[#allocation3 + $0x68] sm:$0xff] }
 0x18f   :  { %1335 = vmatprep.subr.bf16.mxu1 %v1334_v7  ;;  %v524_v1 = vmul.f32 %v1772_v41, %v507_v61  ;;  %v525_v4 = vmul.f32 %v1772_v41, %v508_v63  ;;  %v541_v6 = vld [vmem:[#allocation3 + $0x70] sm:$0xff]  ;;  %v542_v10 = vld [vmem:[#allocation3 + $0x78] sm:$0xff]  ;;  %v992_v15 = vld [vmem:[%s1819_s8] ss:$0 sm:$0xff] }
 0x190   :  { %1309 = vmatpush3.bf16.msra.mxu0 %v1306_v48  ;;  %v550_v48 = vadd.f32 %v534_v43, %v518_v40  ;;  %v554_v0 = vadd.f32 %v538_v59, %v522_v57  ;;  %v757_v12 = vld [vmem:[#allocation15 + $0x70] sm:$0xff]  ;;  %v758_v13 = vld [vmem:[#allocation15 + $0x78] sm:$0xff] }
 0x191   :  { %1311 = vmatprep.subr.bf16.mxu0 %v1310_v54  ;;  %v557_v9 = vadd.f32 %v541_v6, %v525_v4  ;;  %v1350_v14 = vpack.c.bf16 %v758_v13, %v757_v12 }
 0x192   :  { %1337 = vmatpush3.bf16.msra.mxu1 %v1334_v7  ;;  %v556_v7 = vadd.f32 %v540_v3, %v524_v1 }
 0x193   :  { %1339 = vmatprep.subr.bf16.mxu1 %v1338_v16 }
 0x194   :  { %1313 = vmatpush3.bf16.msra.mxu0 %v1310_v54  ;;  %v537_v54 = vld [vmem:[#allocation3 + $0x50] sm:$0xff] }
 0x195   :  { %1315 = vmatprep.subr.bf16.mxu0 %v1314_v62  ;;  %v553_v58 = vadd.f32 %v537_v54, %v521_v52 }
 0x196   :  { %1341 = vmatpush3.bf16.msra.mxu1 %v1338_v16 }
 0x197   :  { %1343 = vmatprep.subr.bf16.mxu1 %v1342_v27 }
 0x198   :  { %1317 = vmatpush3.bf16.msra.mxu0 %v1314_v62  ;;  %v539_v62 = vld [vmem:[#allocation3 + $0x60] sm:$0xff] }
 0x199   :  { %1319 = vmatprep.subr.bf16.mxu0 %v1318_v5  ;;  %v555_v2 = vadd.f32 %v539_v62, %v523_v60 }
 0x19a   :  { %1345 = vmatpush3.bf16.msra.mxu1 %v1342_v27 }
 0x19b   :  { %1347 = vmatprep.subr.bf16.mxu1 %v1346_v38 }
 0x19c   :  { %1321 = vmatpush3.bf16.msra.mxu0 %v1318_v5  ;;  %v509_v5 = vld [vmem:[#allocation12 + $0x78] sm:$0xff] }
 0x19d   :  { %v526_v8 = vmul.f32 %v1772_v41, %v509_v5 }
 0x19e   :  { %1349 = vmatpush3.bf16.msra.mxu1 %v1346_v38 }
 0x19f   :  { %1179 = vmatmul.mubr.f32.vlgmr.msra.gmra.mrb[0].mxu0 %v544_v19  ;;  %v558_v11 = vadd.f32 %v542_v10, %v526_v8  ;;  %1351 = vmatprep.subr.bf16.mxu1 %v1350_v14 }
 0x1a0   :  { %1181 = vmatprep.mubr.f32.mxu0 %v545_v21 }
 0x1a2   :  { %1353 = vmatpush3.bf16.msra.mxu1 %v1350_v14 }
 0x1a3   :  { %1182 = vmatmul.mubr.f32.gmra.mrb[2].mxu0 %v546_v30 }
 0x1a4   :  { %1184 = vmatprep.mubr.f32.mxu0 %v547_v32 }
 0x1a7   :  { %1185 = vmatmul.mubr.f32.gmra.mrb[4].mxu0 %v548_v39 }
 0x1a8   :  { %1187 = vmatprep.mubr.f32.mxu0 %v549_v42 }
 0x1ab   :  { %1188 = vmatmul.mubr.f32.gmra.mrb[6].mxu0 %v550_v48 }
 0x1ac   :  { %1190 = vmatprep.mubr.f32.mxu0 %v551_v50 }
 0x1af   :  { %1191 = vmatmul.mubr.f32.gmra.mrb[8].mxu0 %v552_v56 }
 0x1b0   :  { %1193 = vmatprep.mubr.f32.mxu0 %v553_v58 }
 0x1b3   :  { %1194 = vmatmul.mubr.f32.gmra.mrb[10].mxu0 %v554_v0  ;;  %v993_v0 = vld [vmem:[%s1821_s10] ss:$0 sm:$0xff]  ;;  %s1537_s10 = smov [#allocation17]  }
 0x1b4   :  { %1196 = vmatprep.mubr.f32.mxu0 %v555_v2  ;;  %s932_s20 = sshll.u32 %s1537_s10, 4  ;;  %s933_s20 = int_to_ptr.vmem [resolvable:$true] %s932_s20 }
 0x1b5   :  { %s1488_s9 = scalar_lea.vmem %s933_s20, 2048  ;;  %p1493_p4 = scmp.lt.s32.totalorder %s933_s20, %s933_s20 }
 0x1b6   :  { %p1489_p3 = scmp.ne.s32.totalorder %s933_s20, %s1488_s9  ;;  %p1494_p5 = scmp.lt.s32.totalorder %s1488_s9, %s1488_s9 }
 0x1b7   :  { %1197 = vmatmul.mubr.f32.gmra.mrb[12].mxu0 %v556_v7 }
 0x1b8   :  { %1199 = vmatprep.mubr.f32.mxu0 %v557_v9  ;;  %p1495_p6 = por %p1494_p5, %p1493_p4 }
 0x1ba   :  { %p1496_p7 = pnand %p1495_p6, %p1489_p3 }
 0x1bb   :  { %1200 = vmatmul.mubr.f32.gmra.mrb[14].mxu0 %v558_v11 }
 0x272   :  { %v1180_v16 = vpop.f32.mrb[0].mxu0 }
 0x273   :  { %v654_v17 = vadd.f32 %v1180_v16, %v992_v15  ;;  %v648_v18 = vpop.f32.mrb[1].mxu0 }
 0x274   :  { %v649_v41 = vadd.f32 %v992_v15, %v648_v18 }
 0x275   :  { %v728_v21 = vmax.f32 %v654_v17, 0.0 }
 0x276   :  { %v1183_v19 = vpop.f32.mrb[2].mxu0  ;;  %v727_v20 = vmax.f32 %v649_v41, 0.0 }
 0x277   :  { %v664_v22 = vadd.f32 %v1183_v19, %v992_v15  ;;  %v658_v23 = vpop.f32.mrb[3].mxu0 }
 0x278   :  { %v659_v24 = vadd.f32 %v992_v15, %v658_v23  ;;  %1234 = vmatprep.mubr.f32.mxu1 %v727_v20 }
 0x279   :  { %1235 = vmatmul.mubr.f32.vlgmr.msra.gmra.mrb[0].mxu1 %v728_v21  ;;  %v730_v27 = vmax.f32 %v664_v22, 0.0 }
 0x27a   :  { %v729_v25 = vmax.f32 %v659_v24, 0.0  ;;  %v1186_v26 = vpop.f32.mrb[4].mxu0 }
 0x27b   :  { %v674_v28 = vadd.f32 %v1186_v26, %v992_v15  ;;  %v668_v29 = vpop.f32.mrb[5].mxu0 }
 0x27c   :  { %v669_v30 = vadd.f32 %v992_v15, %v668_v29  ;;  %1237 = vmatprep.mubr.f32.mxu1 %v729_v25 }
 0x27d   :  { %1238 = vmatmul.mubr.f32.gmra.mrb[2].mxu1 %v730_v27  ;;  %v732_v33 = vmax.f32 %v674_v28, 0.0 }
 0x27e   :  { %v731_v31 = vmax.f32 %v669_v30, 0.0  ;;  %v1189_v32 = vpop.f32.mrb[6].mxu0 }
 0x27f   :  { %v684_v34 = vadd.f32 %v1189_v32, %v992_v15  ;;  %v678_v35 = vpop.f32.mrb[7].mxu0 }
 0x280   :  { %v679_v36 = vadd.f32 %v992_v15, %v678_v35  ;;  %1240 = vmatprep.mubr.f32.mxu1 %v731_v31 }
 0x281   :  { %1241 = vmatmul.mubr.f32.gmra.mrb[4].mxu1 %v732_v33  ;;  %v734_v39 = vmax.f32 %v684_v34, 0.0 }
 0x282   :  { %v733_v37 = vmax.f32 %v679_v36, 0.0  ;;  %v1192_v38 = vpop.f32.mrb[8].mxu0 }
 0x283   :  { %v694_v40 = vadd.f32 %v1192_v38, %v992_v15  ;;  %v688_v42 = vpop.f32.mrb[9].mxu0 }
 0x284   :  { %v689_v43 = vadd.f32 %v992_v15, %v688_v42  ;;  %1243 = vmatprep.mubr.f32.mxu1 %v733_v37 }
 0x285   :  { %1244 = vmatmul.mubr.f32.gmra.mrb[6].mxu1 %v734_v39  ;;  %v736_v46 = vmax.f32 %v694_v40, 0.0 }
 0x286   :  { %v735_v44 = vmax.f32 %v689_v43, 0.0  ;;  %v1195_v45 = vpop.f32.mrb[10].mxu0 }
 0x287   :  { %v704_v47 = vadd.f32 %v1195_v45, %v992_v15  ;;  %v698_v48 = vpop.f32.mrb[11].mxu0 }
 0x288   :  { %v699_v49 = vadd.f32 %v992_v15, %v698_v48  ;;  %1246 = vmatprep.mubr.f32.mxu1 %v735_v44 }
 0x289   :  { %1247 = vmatmul.mubr.f32.gmra.mrb[8].mxu1 %v736_v46  ;;  %v738_v52 = vmax.f32 %v704_v47, 0.0 }
 0x28a   :  { %v737_v50 = vmax.f32 %v699_v49, 0.0  ;;  %v1198_v51 = vpop.f32.mrb[12].mxu0 }
 0x28b   :  { %v714_v53 = vadd.f32 %v1198_v51, %v992_v15  ;;  %v708_v54 = vpop.f32.mrb[13].mxu0 }
 0x28c   :  { %v709_v55 = vadd.f32 %v992_v15, %v708_v54  ;;  %1249 = vmatprep.mubr.f32.mxu1 %v737_v50 }
 0x28d   :  { %1250 = vmatmul.mubr.f32.gmra.mrb[10].mxu1 %v738_v52  ;;  %v740_v58 = vmax.f32 %v714_v53, 0.0 }
 0x28e   :  { %v739_v56 = vmax.f32 %v709_v55, 0.0  ;;  %v1201_v57 = vpop.f32.mrb[14].mxu0 }
 0x28f   :  { %v724_v59 = vadd.f32 %v1201_v57, %v992_v15  ;;  %v718_v60 = vpop.f32.mrb[15].mxu0 }
 0x290   :  { %v719_v61 = vadd.f32 %v992_v15, %v718_v60  ;;  %1252 = vmatprep.mubr.f32.mxu1 %v739_v56 }
 0x291   :  { %1253 = vmatmul.mubr.f32.gmra.mrb[12].mxu1 %v740_v58  ;;  %v742_v63 = vmax.f32 %v724_v59, 0.0 }
 0x292   :  { %v741_v62 = vmax.f32 %v719_v61, 0.0 }
 0x294   :  { %1255 = vmatprep.mubr.f32.mxu1 %v741_v62 }
 0x295   :  { %1256 = vmatmul.mubr.f32.gmra.mrb[14].mxu1 %v742_v63 }
 0x34c   :  { %v1236_v1 = vpop.f32.mrb[0].mxu1 }
 0x34d   :  { %v838_v2 = vadd.f32 %v1236_v1, %v993_v0  ;;  %v832_v3 = vpop.f32.mrb[1].mxu1 }
 0x34e   :  { %v833_v4 = vadd.f32 %v993_v0, %v832_v3 }
 0x34f   :  { %912 = vst [vmem:[#allocation17 + $0x8] sm:$0xff] %v838_v2 }
 0x350   :  { %911 = vst [vmem:[#allocation17] sm:$0xff] %v833_v4  ;;  %v1239_v5 = vpop.f32.mrb[2].mxu1 }
 0x351   :  { %v848_v6 = vadd.f32 %v1239_v5, %v993_v0  ;;  %v842_v7 = vpop.f32.mrb[3].mxu1 }
 0x352   :  { %v843_v8 = vadd.f32 %v993_v0, %v842_v7 }
 0x353   :  { %914 = vst [vmem:[#allocation17 + $0x18] sm:$0xff] %v848_v6 }
 0x354   :  { %913 = vst [vmem:[#allocation17 + $0x10] sm:$0xff] %v843_v8  ;;  %v1242_v9 = vpop.f32.mrb[4].mxu1 }
 0x355   :  { %v858_v10 = vadd.f32 %v1242_v9, %v993_v0  ;;  %v852_v11 = vpop.f32.mrb[5].mxu1 }
 0x356   :  { %v853_v12 = vadd.f32 %v993_v0, %v852_v11 }
 0x357   :  { %916 = vst [vmem:[#allocation17 + $0x28] sm:$0xff] %v858_v10 }
 0x358   :  { %915 = vst [vmem:[#allocation17 + $0x20] sm:$0xff] %v853_v12  ;;  %v1245_v13 = vpop.f32.mrb[6].mxu1 }
 0x359   :  { %v868_v14 = vadd.f32 %v1245_v13, %v993_v0  ;;  %v862_v15 = vpop.f32.mrb[7].mxu1 }
 0x35a   :  { %v863_v16 = vadd.f32 %v993_v0, %v862_v15 }
 0x35b   :  { %918 = vst [vmem:[#allocation17 + $0x38] sm:$0xff] %v868_v14 }
 0x35c   :  { %917 = vst [vmem:[#allocation17 + $0x30] sm:$0xff] %v863_v16  ;;  %v1248_v17 = vpop.f32.mrb[8].mxu1 }
 0x35d   :  { %v878_v18 = vadd.f32 %v1248_v17, %v993_v0  ;;  %v872_v41 = vpop.f32.mrb[9].mxu1 }
 0x35e   :  { %v873_v19 = vadd.f32 %v993_v0, %v872_v41 }
 0x35f   :  { %920 = vst [vmem:[#allocation17 + $0x48] sm:$0xff] %v878_v18 }
 0x360   :  { %919 = vst [vmem:[#allocation17 + $0x40] sm:$0xff] %v873_v19  ;;  %v1251_v20 = vpop.f32.mrb[10].mxu1 }
 0x361   :  { %v888_v21 = vadd.f32 %v1251_v20, %v993_v0  ;;  %v882_v22 = vpop.f32.mrb[11].mxu1 }
 0x362   :  { %v883_v23 = vadd.f32 %v993_v0, %v882_v22 }
 0x363   :  { %922 = vst [vmem:[#allocation17 + $0x58] sm:$0xff] %v888_v21 }
 0x364   :  { %921 = vst [vmem:[#allocation17 + $0x50] sm:$0xff] %v883_v23  ;;  %v1254_v24 = vpop.f32.mrb[12].mxu1 }
 0x365   :  { %v898_v25 = vadd.f32 %v1254_v24, %v993_v0  ;;  %v892_v26 = vpop.f32.mrb[13].mxu1 }
 0x366   :  { %v893_v27 = vadd.f32 %v993_v0, %v892_v26 }
 0x367   :  { %924 = vst [vmem:[#allocation17 + $0x68] sm:$0xff] %v898_v25 }
 0x368   :  { %923 = vst [vmem:[#allocation17 + $0x60] sm:$0xff] %v893_v27  ;;  %v1257_v28 = vpop.f32.mrb[14].mxu1 }
 0x369   :  { %v908_v29 = vadd.f32 %v1257_v28, %v993_v0  ;;  %v902_v30 = vpop.f32.mrb[15].mxu1 }
 0x36a   :  { %v903_v31 = vadd.f32 %v993_v0, %v902_v30 }
 0x36b   :  { %926 = vst [vmem:[#allocation17 + $0x78] sm:$0xff] %v908_v29 }
 0x36c   :  { %925 = vst [vmem:[#allocation17 + $0x70] sm:$0xff] %v903_v31 }
 0x36d   :  { %1499 = shalt.err (!%p1496_p7)
}
 0x36e   :  { %s1500_s25 = scalar_lea.hbm %s1822_s11, 2048 }
 0x36f   :  { %p1501_p8 = scmp.ne.s32.totalorder %s1822_s11, %s1500_s25  ;;  %p1504_p9 = scmp.lt.u32.totalorder %s1500_s25, %s1822_s11 }
 0x371   :  { %p1506_p10 = pnand %p1504_p9, %p1501_p8 }
 0x373   :  { %1509 = shalt.err (!%p1506_p10)
}
 0x374   :  { %938 = dma.vmem_to_hbm [thread:$0]  %s933_s20, 2048, %s1822_s11, [#allocation11], %s1531_s15, %s1531_s15, %s1532_s16  }
 0x375   :  { %1522 = dma.done.wait [#allocation11], 2048  }
 0x376   :  { %1523 = vsyncadd [#allocation11], 4294965248 }
 0x377   :  { %942 = vsyncpa [#allocation10], 1 }
 0x378   :  { %943 = vsyncpa [#allocation13], 1 }
 0x379   :  { %944 = vsyncpa [#allocation16], 1 }
 0x37a   :  { %945 = vsyncpa [#allocation11], 1 }

</bundles_post_ra>
